<compile_context>
chip_gen: v6e
topology: v6e:2x2x1
jax: 0.10.0
libtpu: 0.0.40
codegen_flags: <defaults>
</compile_context>

<pallas_src>
import functools

import jax
import jax.numpy as jnp
from jax.experimental import pallas as pl
from jax.experimental.pallas import tpu as pltpu

P = 128          # fused/padded lane width for hidden layers and the output layer
BIAS_ROWS = 8    # sublane-aligned bias block appended to the weight slab (rows 0..2 used)


# ----------------------------------------------------------------------------- kernel helpers
def _fused_mlp(x, w_ref, d_pad):
    """3-layer actor+critic pass over block-diagonal fused weights (biases in the slab).

    Slab rows: [0:d_pad)=W1, [d_pad:d_pad+P)=W2, [d_pad+P:d_pad+2P)=W3,
               [d_pad+2P : d_pad+2P+3) = b1,b2,b3 (rest of the 8-row bias block is 0).
    Output lanes: [0:A) = actor logits, lane A = critic value, rest = 0.
    """
    w1 = w_ref[0:d_pad, :]                       # (d_pad, P)
    w2 = w_ref[d_pad:d_pad + P, :]               # (P, P)
    w3 = w_ref[d_pad + P:d_pad + 2 * P, :]       # (P, P)
    boff = d_pad + 2 * P
    b1 = w_ref[boff + 0:boff + 1, :]             # (1, P)
    b2 = w_ref[boff + 1:boff + 2, :]
    b3 = w_ref[boff + 2:boff + 3, :]

    h = jnp.maximum(jnp.dot(x, w1, preferred_element_type=jnp.float32) + b1, 0.0)
    h = jnp.maximum(jnp.dot(h, w2, preferred_element_type=jnp.float32) + b2, 0.0)
    return jnp.dot(h, w3, preferred_element_type=jnp.float32) + b3   # (B_pad, P)


def _categorical_stats(out, valid):
    """Masked log-softmax statistics over the first A lanes of the fused output."""
    neg = jnp.float32(-1e30)
    logits = jnp.where(valid, out, neg)
    m = jnp.max(logits, axis=-1, keepdims=True)
    e = jnp.exp(jnp.where(valid, out - m, neg))          # underflows to 0 on padded lanes
    s = jnp.sum(e, axis=-1, keepdims=True)
    lse = m + jnp.log(s)
    log_probs = out - lse                                # meaningful on valid lanes only
    probs = e / s
    entropy = -jnp.sum(jnp.where(valid, probs * log_probs, 0.0), axis=-1, keepdims=True)
    return log_probs, entropy


def _pack_outputs(lane, action_i32, logp, value, entropy):
    """Pack the four per-row scalars into one lane-dense (B_pad,128) f32 slab."""
    packed = jnp.where(lane == 0, action_i32.astype(jnp.float32), 0.0)
    packed = jnp.where(lane == 1, logp, packed)
    packed = jnp.where(lane == 2, value, packed)
    packed = jnp.where(lane == 3, entropy, packed)
    return packed


# ----------------------------------------------------------------------------- kernels
def cat_ac_sample_kernel(x_ref, w_ref, g_ref, out_ref, *, d_pad, act_dim):
    x = x_ref[...]
    out = _fused_mlp(x, w_ref, d_pad)                    # (B_pad, P): [logits | value | 0..]

    lane = jax.lax.broadcasted_iota(jnp.int32, out.shape, 1)
    valid = lane < act_dim
    neg = jnp.float32(-1e30)

    log_probs, entropy = _categorical_stats(out, valid)
    value = out[:, act_dim:act_dim + 1]                  # static lane slice (no XLU reduce)

    # Gumbel-max sampling (same distribution as torch.distributions.Categorical.sample).
    gumbel = g_ref[...]                                  # (B_pad, P) f32, precomputed noise
    z = jnp.where(valid, out + gumbel, neg)
    zmax = jnp.max(z, axis=-1, keepdims=True)
    cand = jnp.where(z >= zmax, lane, jnp.int32(P))
    action = jnp.min(cand, axis=-1, keepdims=True)       # (B_pad, 1) int32

    onehot = (lane == action).astype(jnp.float32)
    logp = jnp.sum(jnp.where(valid, onehot * log_probs, 0.0), axis=-1, keepdims=True)

    out_ref[...] = _pack_outputs(lane, action, logp, value, entropy)


def cat_ac_eval_kernel(x_ref, w_ref, action_ref, out_ref, *, d_pad, act_dim):
    x = x_ref[...]
    out = _fused_mlp(x, w_ref, d_pad)

    lane = jax.lax.broadcasted_iota(jnp.int32, out.shape, 1)
    valid = lane < act_dim

    log_probs, entropy = _categorical_stats(out, valid)
    value = out[:, act_dim:act_dim + 1]                  # static lane slice

    action = action_ref[...]                             # (B_pad, 1) int32, given
    onehot = (lane == action).astype(jnp.float32)
    logp = jnp.sum(jnp.where(valid, onehot * log_probs, 0.0), axis=-1, keepdims=True)

    out_ref[...] = _pack_outputs(lane, action, logp, value, entropy)


# ----------------------------------------------------------------------------- params
def init_params(key, input_dim, action_dim, hidden_layer):
    """Deterministic synthetic init mirroring CatACLinearNet layer shapes (f32)."""
    actor_sizes = [input_dim] + hidden_layer + [action_dim]
    critic_sizes = [input_dim] + hidden_layer + [1]

    def make_stack(key, sizes, output_gain):
        params = []
        for i in range(len(sizes) - 1):
            key, kw, kb = jax.random.split(key, 3)
            fan_in, fan_out = sizes[i], sizes[i + 1]
            bound = 1.0 / jnp.sqrt(jnp.float32(fan_in))
            w = jax.random.uniform(kw, (fan_in, fan_out), jnp.float32, -bound, bound)
            b = jax.random.uniform(kb, (1, fan_out), jnp.float32, -bound, bound)
            if i == len(sizes) - 2:
                w = w * output_gain     # output_gain on the final layer weights
            params.extend([w, b])
        return key, params

    key, actor = make_stack(key, actor_sizes, output_gain=0.01)
    key, critic = make_stack(key, critic_sizes, output_gain=1.0)
    return actor, critic


def pack_params(actor_params, critic_params, input_dim, action_dim, hidden_layer):
    """Pack actor+critic into ONE block-diagonal, 128-lane-padded slab (done ONCE)."""
    H1, H2 = hidden_layer
    A = action_dim
    assert 2 * H1 <= P and 2 * H2 <= P and A + 1 <= P, "fused width must fit in 128 lanes"
    assert A < (1 << 24), "action index must round-trip exactly through an f32 lane"
    aw1, ab1, aw2, ab2, aw3, ab3 = actor_params
    cw1, cb1, cw2, cb2, cw3, cb3 = critic_params

    d_pad = ((input_dim + 7) // 8) * 8    # sublane-aligned row count for the W1 block

    w1 = jnp.zeros((d_pad, P), jnp.float32)
    w1 = w1.at[:input_dim, :H1].set(aw1).at[:input_dim, H1:2 * H1].set(cw1)
    b1 = jnp.zeros((P,), jnp.float32)
    b1 = b1.at[:H1].set(ab1.reshape(-1)).at[H1:2 * H1].set(cb1.reshape(-1))

    w2 = jnp.zeros((P, P), jnp.float32)
    w2 = w2.at[:H1, :H2].set(aw2).at[H1:2 * H1, H2:2 * H2].set(cw2)
    b2 = jnp.zeros((P,), jnp.float32)
    b2 = b2.at[:H2].set(ab2.reshape(-1)).at[H2:2 * H2].set(cb2.reshape(-1))

    w3 = jnp.zeros((P, P), jnp.float32)
    w3 = w3.at[:H2, :A].set(aw3).at[H2:2 * H2, A:A + 1].set(cw3)
    b3 = jnp.zeros((P,), jnp.float32)
    b3 = b3.at[:A].set(ab3.reshape(-1)).at[A].set(cb3.reshape(-1)[0])

    bias_block = jnp.zeros((BIAS_ROWS, P), jnp.float32)
    bias_block = bias_block.at[0].set(b1).at[1].set(b2).at[2].set(b3)

    # (d_pad + 2P + 8, 128): weights + sublane-aligned bias block -> single tensor operand.
    w_slab = jnp.concatenate([w1, w2, w3, bias_block], axis=0)
    return w_slab


# ----------------------------------------------------------------------------- wrapper
def cat_ac_forward(x, w_slab, key, action=None, *, action_dim):
    """Returns (action, action_log_prob, value, entropy) like the torch module."""
    B, D = x.shape
    d_pad = w_slab.shape[0] - 2 * P - BIAS_ROWS
    B_pad = max(8, ((B + 7) // 8) * 8)    # full 8-sublane vreg rows -> unmasked vld/vst

    pad_rows = B_pad - B
    pad_cols = d_pad - D
    if pad_rows or pad_cols:
        x = jnp.pad(x, ((0, pad_rows), (0, pad_cols)))

    vmem = pl.BlockSpec(memory_space=pltpu.MemorySpace.VMEM)
    out_shape = jax.ShapeDtypeStruct((B_pad, P), jnp.float32)

    cost = pl.CostEstimate(
        flops=2 * B_pad * (d_pad * P + 2 * P * P),
        transcendentals=4 * B_pad * P,
        bytes_accessed=4 * (B_pad * d_pad + w_slab.size + 2 * B_pad * P),
    )

    if action is None:
        # One fused random op; consumed in-kernel via Gumbel-max.
        gumbel = jax.random.gumbel(key, (B_pad, P), jnp.float32)
        packed = pl.pallas_call(
            functools.partial(cat_ac_sample_kernel, d_pad=d_pad, act_dim=action_dim),
            out_shape=out_shape,
            in_specs=[vmem, vmem, vmem],
            out_specs=vmem,
            cost_estimate=cost,
        )(x, w_slab, gumbel)
    else:
        action_in = action.reshape(B, 1).astype(jnp.int32)
        if pad_rows:
            action_in = jnp.pad(action_in, ((0, pad_rows), (0, 0)))
        packed = pl.pallas_call(
            functools.partial(cat_ac_eval_kernel, d_pad=d_pad, act_dim=action_dim),
            out_shape=out_shape,
            in_specs=[vmem, vmem, vmem],
            out_specs=vmem,
            cost_estimate=cost,
        )(x, w_slab, action_in)

    action_out = packed[:B, 0].astype(jnp.int32)   # small non-negative ints: exact in f32
    logp = packed[:B, 1]
    value = packed[:B, 2]                          # critic output, already squeezed
    entropy = packed[:B, 3]
    return action_out, logp, value, entropy


# ----------------------------------------------------------------------------- reference
def reference_stats(x, actor_params, critic_params, action):
    aw1, ab1, aw2, ab2, aw3, ab3 = actor_params
    cw1, cb1, cw2, cb2, cw3, cb3 = critic_params
    h = jnp.maximum(x @ aw1 + ab1, 0.0)
    h = jnp.maximum(h @ aw2 + ab2, 0.0)
    logits = h @ aw3 + ab3
    h = jnp.maximum(x @ cw1 + cb1, 0.0)
    h = jnp.maximum(h @ cw2 + cb2, 0.0)
    value = (h @ cw3 + cb3)[:, 0]
    logp_all = jax.nn.log_softmax(logits, axis=-1)
    logp = jnp.take_along_axis(logp_all, action[:, None], axis=-1)[:, 0]
    entropy = -jnp.sum(jnp.exp(logp_all) * logp_all, axis=-1)
    return logp, value, entropy


# ----------------------------------------------------------------------------- main
if __name__ == "__main__":
    key = jax.random.PRNGKey(0)
    k_param, k_x, k_sample = jax.random.split(key, 3)

    batch, input_dim, action_dim = 4, 32, 6
    hidden_layer = [64, 32]

    actor_params, critic_params = init_params(k_param, input_dim, action_dim, hidden_layer)
    w_slab = pack_params(actor_params, critic_params, input_dim, action_dim, hidden_layer)
    x = jax.random.normal(k_x, (batch, input_dim), jnp.float32)

    fwd = jax.jit(functools.partial(cat_ac_forward, action_dim=action_dim))

    # sample path (action=None -> Gumbel-max sample inside the kernel)
    action, logp, value, entropy = fwd(x, w_slab, k_sample)
    jax.block_until_ready((action, logp, value, entropy))

    assert action.shape == (batch,) and action.dtype == jnp.int32
    assert logp.shape == (batch,) and value.shape == (batch,) and entropy.shape == (batch,)
    assert bool(jnp.all((action >= 0) & (action < action_dim)))

    # evaluate path (given action) + numerical check against an unfused pure-JAX reference
    action2, logp2, value2, entropy2 = fwd(x, w_slab, k_sample, action)
    jax.block_until_ready((action2, logp2, value2, entropy2))
    ref_logp, ref_value, ref_entropy = reference_stats(x, actor_params, critic_params, action)

    assert bool(jnp.all(action2 == action))
    for got, ref in ((logp, ref_logp), (value, ref_value), (entropy, ref_entropy),
                     (logp2, ref_logp), (value2, ref_value), (entropy2, ref_entropy)):
        assert bool(jnp.allclose(got, ref, rtol=1e-3, atol=1e-3)), (got, ref)

    print("KERNEL_OK")
</pallas_src>

<mosaic_0001>
module attributes {stable_mosaic.version = 11 : i64} {
  func.func @cat_ac_sample_kernel(%arg0: memref<8x32xf32, #tpu.memory_space<vmem>>, %arg1: memref<296x128xf32, #tpu.memory_space<vmem>>, %arg2: memref<8x128xf32, #tpu.memory_space<vmem>>, %arg3: memref<8x128xf32, #tpu.memory_space<vmem>>) attributes {dimension_semantics = [], scalar_prefetch = 0 : i64, scratch_operands = 0 : i64, tpu.core_type = #tpu.core_type<tc>} {
    %c0 = arith.constant 0 : index
    %c0_0 = arith.constant 0 : index
    %0 = vector.load %arg0[%c0, %c0_0] : memref<8x32xf32, #tpu.memory_space<vmem>>, vector<8x32xf32>
    %c0_1 = arith.constant 0 : index
    %c0_2 = arith.constant 0 : index
    %1 = vector.load %arg1[%c0_1, %c0_2] : memref<296x128xf32, #tpu.memory_space<vmem>>, vector<32x128xf32>
    %c32 = arith.constant 32 : index
    %c0_3 = arith.constant 0 : index
    %2 = vector.load %arg1[%c32, %c0_3] : memref<296x128xf32, #tpu.memory_space<vmem>>, vector<128x128xf32>
    %c160 = arith.constant 160 : index
    %c0_4 = arith.constant 0 : index
    %3 = vector.load %arg1[%c160, %c0_4] : memref<296x128xf32, #tpu.memory_space<vmem>>, vector<128x128xf32>
    %c288 = arith.constant 288 : index
    %c0_5 = arith.constant 0 : index
    %4 = vector.load %arg1[%c288, %c0_5] : memref<296x128xf32, #tpu.memory_space<vmem>>, vector<1x128xf32>
    %c289 = arith.constant 289 : index
    %c0_6 = arith.constant 0 : index
    %5 = vector.load %arg1[%c289, %c0_6] : memref<296x128xf32, #tpu.memory_space<vmem>>, vector<1x128xf32>
    %c290 = arith.constant 290 : index
    %c0_7 = arith.constant 0 : index
    %6 = vector.load %arg1[%c290, %c0_7] : memref<296x128xf32, #tpu.memory_space<vmem>>, vector<1x128xf32>
    %cst = arith.constant dense<0.000000e+00> : vector<8x128xf32>
    %7 = tpu.matmul %0, %1, %cst {dimension_numbers = #tpu.dot_dimension_numbers<[1], [0], [0], [1], [0, 0, 1, 1], [], []>} : vector<8x32xf32>, vector<32x128xf32>, vector<8x128xf32> -> vector<8x128xf32>
    %8 = vector.broadcast %4 : vector<1x128xf32> to vector<8x128xf32>
    %9 = arith.addf %7, %8 : vector<8x128xf32>
    %cst_8 = arith.constant 0.000000e+00 : f32
    %10 = vector.broadcast %cst_8 : f32 to vector<8x128xf32>
    %11 = arith.maximumf %9, %10 : vector<8x128xf32>
    %cst_9 = arith.constant dense<0.000000e+00> : vector<8x128xf32>
    %12 = tpu.matmul %11, %2, %cst_9 {dimension_numbers = #tpu.dot_dimension_numbers<[1], [0], [0], [1], [0, 0, 1, 1], [], []>} : vector<8x128xf32>, vector<128x128xf32>, vector<8x128xf32> -> vector<8x128xf32>
    %13 = vector.broadcast %5 : vector<1x128xf32> to vector<8x128xf32>
    %14 = arith.addf %12, %13 : vector<8x128xf32>
    %cst_10 = arith.constant 0.000000e+00 : f32
    %15 = vector.broadcast %cst_10 : f32 to vector<8x128xf32>
    %16 = arith.maximumf %14, %15 : vector<8x128xf32>
    %cst_11 = arith.constant dense<0.000000e+00> : vector<8x128xf32>
    %17 = tpu.matmul %16, %3, %cst_11 {dimension_numbers = #tpu.dot_dimension_numbers<[1], [0], [0], [1], [0, 0, 1, 1], [], []>} : vector<8x128xf32>, vector<128x128xf32>, vector<8x128xf32> -> vector<8x128xf32>
    %18 = vector.broadcast %6 : vector<1x128xf32> to vector<8x128xf32>
    %19 = arith.addf %17, %18 : vector<8x128xf32>
    %20 = tpu.iota {dimensions = array<i32: 1>} : vector<8x128xi32>
    %c6_i32 = arith.constant 6 : i32
    %21 = vector.broadcast %c6_i32 : i32 to vector<8x128xi32>
    %22 = arith.cmpi slt, %20, %21 : vector<8x128xi32>
    %cst_12 = arith.constant -1.000000e+30 : f32
    %23 = vector.broadcast %cst_12 : f32 to vector<8x128xf32>
    %24 = arith.select %22, %19, %23 : vector<8x128xi1>, vector<8x128xf32>
    %cst_13 = arith.constant dense<0xFF800000> : vector<8xf32>
    %25 = vector.multi_reduction <maximumf>, %24, %cst_13 [1] : vector<8x128xf32> to vector<8xf32>
    %26 = vector.shape_cast %25 : vector<8xf32> to vector<8x1xf32>
    %27 = vector.broadcast %26 : vector<8x1xf32> to vector<8x128xf32>
    %28 = arith.subf %19, %27 : vector<8x128xf32>
    %cst_14 = arith.constant -1.000000e+30 : f32
    %29 = vector.broadcast %cst_14 : f32 to vector<8x128xf32>
    %30 = arith.select %22, %28, %29 : vector<8x128xi1>, vector<8x128xf32>
    %31 = math.exp %30 : vector<8x128xf32>
    %cst_15 = arith.constant dense<0.000000e+00> : vector<8xf32>
    %32 = vector.multi_reduction <add>, %31, %cst_15 [1] : vector<8x128xf32> to vector<8xf32>
    %33 = vector.shape_cast %32 : vector<8xf32> to vector<8x1xf32>
    %34 = math.log %33 : vector<8x1xf32>
    %35 = arith.addf %26, %34 : vector<8x1xf32>
    %36 = vector.broadcast %35 : vector<8x1xf32> to vector<8x128xf32>
    %37 = arith.subf %19, %36 : vector<8x128xf32>
    %38 = vector.broadcast %33 : vector<8x1xf32> to vector<8x128xf32>
    %39 = arith.divf %31, %38 : vector<8x128xf32>
    %40 = arith.mulf %39, %37 : vector<8x128xf32>
    %cst_16 = arith.constant 0.000000e+00 : f32
    %41 = vector.broadcast %cst_16 : f32 to vector<8x128xf32>
    %42 = arith.select %22, %40, %41 : vector<8x128xi1>, vector<8x128xf32>
    %cst_17 = arith.constant dense<0.000000e+00> : vector<8xf32>
    %43 = vector.multi_reduction <add>, %42, %cst_17 [1] : vector<8x128xf32> to vector<8xf32>
    %44 = vector.shape_cast %43 : vector<8xf32> to vector<8x1xf32>
    %cst_18 = arith.constant 0.000000e+00 : f32
    %45 = vector.broadcast %cst_18 : f32 to vector<8x1xf32>
    %46 = arith.subf %45, %44 : vector<8x1xf32>
    %47 = vector.extract_strided_slice %19 {offsets = [0, 6], sizes = [8, 1], strides = [1, 1]} : vector<8x128xf32> to vector<8x1xf32>
    %c0_19 = arith.constant 0 : index
    %c0_20 = arith.constant 0 : index
    %48 = vector.load %arg2[%c0_19, %c0_20] : memref<8x128xf32, #tpu.memory_space<vmem>>, vector<8x128xf32>
    %49 = arith.addf %19, %48 : vector<8x128xf32>
    %cst_21 = arith.constant -1.000000e+30 : f32
    %50 = vector.broadcast %cst_21 : f32 to vector<8x128xf32>
    %51 = arith.select %22, %49, %50 : vector<8x128xi1>, vector<8x128xf32>
    %cst_22 = arith.constant dense<0xFF800000> : vector<8xf32>
    %52 = vector.multi_reduction <maximumf>, %51, %cst_22 [1] : vector<8x128xf32> to vector<8xf32>
    %53 = vector.shape_cast %52 : vector<8xf32> to vector<8x1xf32>
    %54 = vector.broadcast %53 : vector<8x1xf32> to vector<8x128xf32>
    %55 = arith.cmpf oge, %51, %54 : vector<8x128xf32>
    %c128_i32 = arith.constant 128 : i32
    %56 = vector.broadcast %c128_i32 : i32 to vector<8x128xi32>
    %57 = arith.select %55, %20, %56 : vector<8x128xi1>, vector<8x128xi32>
    %cst_23 = arith.constant dense<2147483647> : vector<8xi32>
    %58 = vector.multi_reduction <minsi>, %57, %cst_23 [1] : vector<8x128xi32> to vector<8xi32>
    %59 = vector.shape_cast %58 : vector<8xi32> to vector<8x1xi32>
    %60 = vector.broadcast %59 : vector<8x1xi32> to vector<8x128xi32>
    %61 = arith.cmpi eq, %20, %60 : vector<8x128xi32>
    %62 = arith.extui %61 : vector<8x128xi1> to vector<8x128xi32>
    %63 = arith.sitofp %62 : vector<8x128xi32> to vector<8x128xf32>
    %64 = arith.mulf %63, %37 : vector<8x128xf32>
    %cst_24 = arith.constant 0.000000e+00 : f32
    %65 = vector.broadcast %cst_24 : f32 to vector<8x128xf32>
    %66 = arith.select %22, %64, %65 : vector<8x128xi1>, vector<8x128xf32>
    %cst_25 = arith.constant dense<0.000000e+00> : vector<8xf32>
    %67 = vector.multi_reduction <add>, %66, %cst_25 [1] : vector<8x128xf32> to vector<8xf32>
    %68 = vector.shape_cast %67 : vector<8xf32> to vector<8x1xf32>
    %c0_i32 = arith.constant 0 : i32
    %69 = vector.broadcast %c0_i32 : i32 to vector<8x128xi32>
    %70 = arith.cmpi eq, %20, %69 : vector<8x128xi32>
    %71 = arith.sitofp %59 : vector<8x1xi32> to vector<8x1xf32>
    %cst_26 = arith.constant 0.000000e+00 : f32
    %72 = vector.shape_cast %71 : vector<8x1xf32> to vector<8x1xf32>
    %73 = vector.broadcast %72 : vector<8x1xf32> to vector<8x128xf32>
    %74 = vector.broadcast %cst_26 : f32 to vector<8x128xf32>
    %75 = arith.select %70, %73, %74 : vector<8x128xi1>, vector<8x128xf32>
    %c1_i32 = arith.constant 1 : i32
    %76 = vector.broadcast %c1_i32 : i32 to vector<8x128xi32>
    %77 = arith.cmpi eq, %20, %76 : vector<8x128xi32>
    %78 = vector.shape_cast %68 : vector<8x1xf32> to vector<8x1xf32>
    %79 = vector.broadcast %78 : vector<8x1xf32> to vector<8x128xf32>
    %80 = arith.select %77, %79, %75 : vector<8x128xi1>, vector<8x128xf32>
    %c2_i32 = arith.constant 2 : i32
    %81 = vector.broadcast %c2_i32 : i32 to vector<8x128xi32>
    %82 = arith.cmpi eq, %20, %81 : vector<8x128xi32>
    %83 = vector.shape_cast %47 : vector<8x1xf32> to vector<8x1xf32>
    %84 = vector.broadcast %83 : vector<8x1xf32> to vector<8x128xf32>
    %85 = arith.select %82, %84, %80 : vector<8x128xi1>, vector<8x128xf32>
    %c3_i32 = arith.constant 3 : i32
    %86 = vector.broadcast %c3_i32 : i32 to vector<8x128xi32>
    %87 = arith.cmpi eq, %20, %86 : vector<8x128xi32>
    %88 = vector.shape_cast %46 : vector<8x1xf32> to vector<8x1xf32>
    %89 = vector.broadcast %88 : vector<8x1xf32> to vector<8x128xf32>
    %90 = arith.select %87, %89, %85 : vector<8x128xi1>, vector<8x128xf32>
    %c0_27 = arith.constant 0 : index
    %c0_28 = arith.constant 0 : index
    %91 = vector.load %arg3[%c0_27, %c0_28] : memref<8x128xf32, #tpu.memory_space<vmem>>, vector<8x128xf32>
    tpu.vector_store %arg3[%c0_27, %c0_28], %90 {strides = array<i32>} : memref<8x128xf32, #tpu.memory_space<vmem>>, vector<8x128xf32>,
    return
  }
}

</mosaic_0001>

<bundles_post_ra>
// kernel: cat_ac_forward.1
= control target key start
LH: loop header
LB: loop body
LE: loop exit
PB: predicated region body
PF: predicated region fallthrough
CT: control target
= control target key end

     0   :  { %8 = vsyncpa [#allocation3], 0  ;;  %s528_s12 = smov [#allocation2]   ;;  %s628_s0 = inlined_call_operand.vmem [shape: f32[8,32], index: 0, kind: input, shape index: {}]   ;;  %s629_s1 = inlined_call_operand.hbm [shape: f32[296,128], index: 1, kind: input, shape index: {}]   ;;  %s630_s2 = inlined_call_operand.vmem [shape: f32[8,128], index: 2, kind: input, shape index: {}]   ;;  %s631_s3 = inlined_call_operand.vmem [shape: f32[8,128], index: 3, kind: output, shape index: {}]  }
   0x1   :  { %s16_s13 = sshll.u32 %s528_s12, 4  ;;  %s17_s13 = int_to_ptr.vmem [resolvable:$true] %s16_s13 }
   0x2   :  { %s514_s14 = scalar_lea.vmem %s17_s13, 4736  ;;  %p519_p1 = scmp.lt.s32.totalorder %s17_s13, %s17_s13 }
   0x3   :  { %p515_p0 = scmp.ne.s32.totalorder %s17_s13, %s514_s14  ;;  %p520_p2 = scmp.lt.s32.totalorder %s514_s14, %s514_s14 }
   0x5   :  { %p521_p3 = por %p520_p2, %p519_p1 }
   0x7   :  { %p522_p4 = pnand %p521_p3, %p515_p0 }
   0x9   :  { %525 = shalt.err (!%p522_p4)
}
   0xa   :  { %s529_s15 = smov 128   ;;  %s530_s16 = smov 8  }
   0xb   :  { %22 = dma.hbm_to_vmem [thread:$0]  %s629_s1, 4736, %s17_s13, [#allocation3], %s529_s15, %s529_s15, %s530_s16  }
   0xc   :  { %526 = dma.done.wait [#allocation3], 4736  }
   0xd   :  { %527 = vsyncadd [#allocation3], 4294962560  ;;  %v531_v0 = vmov 0.0   ;;  %vm532_vm0 = vmmov 0   ;;  %v32_v1 = vld [vmem:[#allocation2 + $0x18] sm:$0xff]  ;;  %v31_v2 = vld [vmem:[#allocation2 + $0x10] sm:$0xff]  ;;  %v296_v48 = vlaneseq }
   0xe   :  { %411 = vmatprep.subr.mxu0 %v531_v0  ;;  %419 = vmatprep.mubr.msk.f32.mxu0 %vm532_vm0, %v531_v0  ;;  %v48_v3 = vld [vmem:[#allocation2 + $0x98] sm:$0xff]  ;;  %v30_v4 = vld [vmem:[#allocation2 + $0x8] sm:$0xff]  ;;  %v47_v5 = vld [vmem:[#allocation2 + $0x90] sm:$0xff]  ;;  %vm72_vm1 = vcmask 261120  }
   0xf   :  { %422 = vmatprep.subr.mxu1 %v531_v0  ;;  %454 = vmatprep.mubr.msk.f32.mxu1 %vm532_vm0, %v531_v0  ;;  %v46_v6 = vld [vmem:[#allocation2 + $0x88] sm:$0xff]  ;;  %v29_v7 = vld [vmem:[#allocation2] sm:$0xff]  ;;  %v44_v10 = vld [vmem:[#allocation2 + $0x78] sm:$0xff]  ;;  %v602_v51 = vand.u32 127, %v296_v48 }
  0x10   :  { %412 = vmatpush3.msra.mxu0 %v32_v1  ;;  %423 = vmatpush3.msra.mxu1 %v48_v3  ;;  %v28_v8 = vld [vmem:[%s628_s0] sm:$0xff]  ;;  %v43_v11 = vld [vmem:[#allocation2 + $0x70] sm:$0xff]  ;;  %v42_v12 = vld [vmem:[#allocation2 + $0x68] sm:$0xff] }
  0x11   :  { %413 = vmatprep.subr.mxu0 %v531_v0  ;;  %424 = vmatprep.subr.mxu1 %v531_v0  ;;  %v45_v9 = vld [vmem:[#allocation2 + $0x80] sm:$0xff]  ;;  %v40_v14 = vld [vmem:[#allocation2 + $0x58] sm:$0xff]  ;;  %v39_v15 = vld [vmem:[#allocation2 + $0x50] sm:$0xff]  ;;  %vm298_vm2 = vcmp.lt.s32.totalorder %v602_v51, 6  ;;  %vm347_vm6 = vcmp.eq.s32.totalorder %v602_v51, 0  ;;  %vm350_vm7 = vcmp.eq.s32.totalorder %v602_v51, 1 }
  0x12   :  { %414 = vmatpush3.msra.mxu0 %v31_v2  ;;  %425 = vmatpush3.msra.mxu1 %v47_v5  ;;  %v41_v13 = vld [vmem:[#allocation2 + $0x60] sm:$0xff]  ;;  %v38_v16 = vld [vmem:[#allocation2 + $0x48] sm:$0xff]  ;;  %v36_v18 = vld [vmem:[#allocation2 + $0x38] sm:$0xff]  ;;  %vm352_vm8 = vcmp.eq.s32.totalorder %v602_v51, 2  ;;  %vm359_vm9 = vcmp.eq.s32.totalorder %v602_v51, 3 }
  0x13   :  { %415 = vmatprep.subr.mxu0 %v531_v0  ;;  %426 = vmatprep.subr.mxu1 %v531_v0  ;;  %v37_v17 = vld [vmem:[#allocation2 + $0x40] sm:$0xff]  ;;  %v35_v19 = vld [vmem:[#allocation2 + $0x30] sm:$0xff]  ;;  %v34_v20 = vld [vmem:[#allocation2 + $0x28] sm:$0xff] }
  0x14   :  { %416 = vmatpush3.msra.mxu0 %v30_v4  ;;  %427 = vmatpush3.msra.mxu1 %v46_v6  ;;  %v33_v21 = vld [vmem:[#allocation2 + $0x20] sm:$0xff]  ;;  %v64_v22 = vld [vmem:[#allocation2 + $0x118] sm:$0xff]  ;;  %v63_v23 = vld [vmem:[#allocation2 + $0x110] sm:$0xff]  ;;  %v533_v4 = vmov 6  }
  0x15   :  { %417 = vmatprep.subr.mxu0 %v531_v0  ;;  %428 = vmatprep.subr.mxu1 %v531_v0  ;;  %v62_v24 = vld [vmem:[#allocation2 + $0x108] sm:$0xff]  ;;  %v61_v25 = vld [vmem:[#allocation2 + $0x100] sm:$0xff]  ;;  %v60_v26 = vld [vmem:[#allocation2 + $0xf8] sm:$0xff] }
  0x16   :  { %418 = vmatpush3.msra.mxu0 %v29_v7  ;;  %429 = vmatpush3.msra.mxu1 %v45_v9  ;;  %v59_v27 = vld [vmem:[#allocation2 + $0xf0] sm:$0xff]  ;;  %v58_v28 = vld [vmem:[#allocation2 + $0xe8] sm:$0xff]  ;;  %v57_v29 = vld [vmem:[#allocation2 + $0xe0] sm:$0xff] }
  0x17   :  { %420 = vmatmul.mubr.msk.f32.vlgmr.msra.gmra.mxu0 %vm72_vm1, %v28_v8  ;;  %430 = vmatprep.subr.mxu1 %v531_v0  ;;  %v56_v30 = vld [vmem:[#allocation2 + $0xd8] sm:$0xff]  ;;  %v55_v31 = vld [vmem:[#allocation2 + $0xd0] sm:$0xff]  ;;  %v54_v32 = vld [vmem:[#allocation2 + $0xc8] sm:$0xff] }
  0x18   :  { %457 = vmatprep.subr.mxu0 %v531_v0  ;;  %431 = vmatpush3.msra.mxu1 %v44_v10  ;;  %v53_v33 = vld [vmem:[#allocation2 + $0xc0] sm:$0xff]  ;;  %v52_v34 = vld [vmem:[#allocation2 + $0xb8] sm:$0xff]  ;;  %v51_v40 = vld [vmem:[#allocation2 + $0xb0] sm:$0xff] }
  0x19   :  { %489 = vmatprep.mubr.msk.f32.mxu0 %vm532_vm0, %v531_v0  ;;  %432 = vmatprep.subr.mxu1 %v531_v0  ;;  %v367_v35 = vld [vmem:[#allocation2 + $0x120] ss:$0 sm:$0xff]  ;;  %v50_v41 = vld [vmem:[#allocation2 + $0xa8] sm:$0xff]  ;;  %v369_v43 = vld [vmem:[#allocation2 + $0x121] ss:$0 sm:$0xff] }
  0x1a   :  { %433 = vmatpush3.msra.mxu1 %v43_v11  ;;  %458 = vmatpush3.msra.mxu0 %v64_v22  ;;  %v49_v42 = vld [vmem:[#allocation2 + $0xa0] sm:$0xff] }
  0x1b   :  { %434 = vmatprep.subr.mxu1 %v531_v0  ;;  %459 = vmatprep.subr.mxu0 %v531_v0  ;;  %v370_v49 = vld [vmem:[#allocation2 + $0x122] ss:$0 sm:$0xff] }
  0x1c   :  { %435 = vmatpush3.msra.mxu1 %v42_v12  ;;  %460 = vmatpush3.msra.mxu0 %v63_v23  ;;  %v319_v52 = vld [vmem:[%s630_s2] sm:$0xff] }
  0x1d   :  { %436 = vmatprep.subr.mxu1 %v531_v0  ;;  %461 = vmatprep.subr.mxu0 %v531_v0 }
  0x1e   :  { %437 = vmatpush3.msra.mxu1 %v41_v13  ;;  %462 = vmatpush3.msra.mxu0 %v62_v24 }
  0x1f   :  { %438 = vmatprep.subr.mxu1 %v531_v0  ;;  %463 = vmatprep.subr.mxu0 %v531_v0 }
  0x20   :  { %439 = vmatpush3.msra.mxu1 %v40_v14  ;;  %464 = vmatpush3.msra.mxu0 %v61_v25 }
  0x21   :  { %440 = vmatprep.subr.mxu1 %v531_v0  ;;  %465 = vmatprep.subr.mxu0 %v531_v0 }
  0x22   :  { %441 = vmatpush3.msra.mxu1 %v39_v15  ;;  %466 = vmatpush3.msra.mxu0 %v60_v26 }
  0x23   :  { %442 = vmatprep.subr.mxu1 %v531_v0  ;;  %467 = vmatprep.subr.mxu0 %v531_v0 }
  0x24   :  { %443 = vmatpush3.msra.mxu1 %v38_v16  ;;  %468 = vmatpush3.msra.mxu0 %v59_v27 }
  0x25   :  { %444 = vmatprep.subr.mxu1 %v531_v0  ;;  %469 = vmatprep.subr.mxu0 %v531_v0 }
  0x26   :  { %445 = vmatpush3.msra.mxu1 %v37_v17  ;;  %470 = vmatpush3.msra.mxu0 %v58_v28 }
  0x27   :  { %446 = vmatprep.subr.mxu1 %v531_v0  ;;  %471 = vmatprep.subr.mxu0 %v531_v0 }
  0x28   :  { %447 = vmatpush3.msra.mxu1 %v36_v18  ;;  %472 = vmatpush3.msra.mxu0 %v57_v29 }
  0x29   :  { %448 = vmatprep.subr.mxu1 %v531_v0  ;;  %473 = vmatprep.subr.mxu0 %v531_v0 }
  0x2a   :  { %449 = vmatpush3.msra.mxu1 %v35_v19  ;;  %474 = vmatpush3.msra.mxu0 %v56_v30 }
  0x2b   :  { %450 = vmatprep.subr.mxu1 %v531_v0  ;;  %475 = vmatprep.subr.mxu0 %v531_v0 }
  0x2c   :  { %451 = vmatpush3.msra.mxu1 %v34_v20  ;;  %476 = vmatpush3.msra.mxu0 %v55_v31 }
  0x2d   :  { %452 = vmatprep.subr.mxu1 %v531_v0  ;;  %477 = vmatprep.subr.mxu0 %v531_v0 }
  0x2e   :  { %453 = vmatpush3.msra.mxu1 %v33_v21  ;;  %478 = vmatpush3.msra.mxu0 %v54_v32 }
  0x2f   :  { %479 = vmatprep.subr.mxu0 %v531_v0  ;;  %498 = vset.pattern.permute.xlu1 %v533_v4 }
  0x30   :  { %480 = vmatpush3.msra.mxu0 %v53_v33  ;;  %499 = vset.pattern.permute.xlu0 %v533_v4 }
  0x31   :  { %481 = vmatprep.subr.mxu0 %v531_v0 }
  0x32   :  { %482 = vmatpush3.msra.mxu0 %v52_v34 }
  0x33   :  { %483 = vmatprep.subr.mxu0 %v531_v0 }
  0x34   :  { %484 = vmatpush3.msra.mxu0 %v51_v40 }
  0x35   :  { %485 = vmatprep.subr.mxu0 %v531_v0 }
  0x36   :  { %486 = vmatpush3.msra.mxu0 %v50_v41 }
  0x37   :  { %487 = vmatprep.subr.mxu0 %v531_v0 }
  0x38   :  { %488 = vmatpush3.msra.mxu0 %v49_v42 }
  0xd7   :  { %v142_v36 = vpop.f32.mrf.mxu0 }
  0xd8   :  { %v143_v37 = vadd.f32 %v367_v35, %v142_v36 }
  0xd9   :  { %v421_v38 = vpop.f32.mrf.mxu0 }
  0xda   :  { %v146_v39 = vmax.f32 %v143_v37, 0.0 }
  0xdc   :  { %455 = vmatmul.mubr.f32.vlgmr.msra.gmra.mxu1 %v146_v39 }
 0x19c   :  { %v217_v44 = vpop.f32.mrf.mxu1 }
 0x19d   :  { %v218_v45 = vadd.f32 %v369_v43, %v217_v44 }
 0x19e   :  { %v456_v46 = vpop.f32.mrf.mxu1 }
 0x19f   :  { %v221_v47 = vmax.f32 %v218_v45, 0.0 }
 0x1a1   :  { %490 = vmatmul.mubr.f32.vlgmr.msra.gmra.mxu0 %v221_v47 }
 0x261   :  { %v292_v50 = vpop.f32.mrf.mxu0 }
 0x262   :  { %v293_v53 = vadd.f32 %v370_v49, %v292_v50 }
 0x263   :  { %v491_v54 = vpop.f32.mrf.mxu0 }
 0x264   :  { %v320_v55 = vadd.f32 %v319_v52, %v293_v53  ;;  %v299_v57 = vsel %vm298_vm2, %v293_v53, -1e+30 }
 0x266   :  { %v321_v56 = vsel %vm298_vm2, %v320_v55, -1e+30 }
 0x267   :  { %322 = vmax.xlane.f32.xlu0 %v321_v56 }
 0x26b   :  { %300 = vmax.xlane.f32.xlu0 %v299_v57 }
 0x2f0   :  { %v323_v58 = vpop.xlane.xlu0 %322 }
 0x2f1   :  { %vm324_vm3 = vcmp.ge.f32.partialorder %v321_v56, %v323_v58 }
 0x2f2   :  { %v325_v59 = vsel %vm324_vm3, %v602_v51, 128 }
 0x2f3   :  { %v327_v60 = vshra.s32 %v325_v59, 16  ;;  %v326_v5 = vand.u32 65535, %v325_v59 }
 0x2f4   :  { %v301_v61 = vpop.xlane.xlu0 %300 }
 0x2f5   :  { %v302_v62 = vsub.f32 %v293_v53, %v301_v61  ;;  %v329_v63 = vcvt.s32.f32 %v327_v60  ;;  %v328_v7 = vcvt.s32.f32 %v326_v5 }
 0x2f7   :  { %v303_v1 = vsel %vm298_vm2, %v302_v62, -1e+30  ;;  %330 = vmin.xlane.f32.xlu1 %v329_v63 }
 0x2f8   :  { %v304_v2 = vmul.f32 1.442695, %v303_v1 }
 0x2fa   :  { %500 = vpow2.f32 %v304_v2 }
 0x307   :  { %v501_v3 = vpop.eup %500 }
 0x308   :  { %306 = vadd.xlane.f32.xlu1 %v501_v3 }
 0x380   :  { %v331_v6 = vpop.xlane.xlu1 %330 }
 0x381   :  { %vm332_vm4 = vcmp.eq.f32.partialorder %v329_v63, %v331_v6  ;;  %v337_v18 = vcvt.f32.s32 %v331_v6 }
 0x382   :  { %v333_v8 = vsel %vm332_vm4, %v328_v7, inf }
 0x383   :  { %334 = vmin.xlane.f32.xlu0 %v333_v8  ;;  %v338_v20 = vshll.u32 %v337_v18, 16 }
 0x391   :  { %v307_v9 = vpop.xlane.xlu1 %306 }
 0x392   :  { %502 = vlog2.f32 %v307_v9 }
 0x393   :  { %504 = vrcp.f32 %v307_v9 }
 0x39f   :  { %v503_v10 = vpop.eup %502 }
 0x3a0   :  { %v309_v11 = vmul.f32 0.6931472, %v503_v10  ;;  %v505_v12 = vpop.eup %504 }
 0x3a1   :  { %v313_v15 = vmul.f32 %v505_v12, %v501_v3 }
 0x3a2   :  { %v310_v13 = vadd.f32 %v309_v11, %v301_v61 }
 0x3a4   :  { %v311_v14 = vsub.f32 %v293_v53, %v310_v13 }
 0x3a6   :  { %v314_v16 = vmul.f32 %v313_v15, %v311_v14 }
 0x3a8   :  { %v315_v17 = vsel %vm298_vm2, %v314_v16, 0.0 }
 0x3a9   :  { %316 = vadd.xlane.f32.xlu1 %v315_v17 }
 0x3ba   :  { %355 = vperm.xlu1 %498, %v293_v53  }
 0x40c   :  { %v335_v19 = vpop.xlane.xlu0 %334 }
 0x40d   :  { %v336_v21 = vcvt.f32.s32 %v335_v19 }
 0x40f   :  { %v339_v22 = vadd.s32 %v338_v20, %v336_v21 }
 0x411   :  { %vm340_vm5 = vcmp.eq.s32.totalorder %v602_v51, %v339_v22  ;;  %v348_v27 = vcvt.s32.f32 %v339_v22 }
 0x412   :  { %v371_v23 = vsel %vm340_vm5, 1.0, %v531_v0 }
 0x413   :  { %v343_v24 = vmul.f32 %v371_v23, %v311_v14  ;;  %v349_v28 = vsel %vm347_vm6, %v348_v27, 0.0 }
 0x415   :  { %v344_v25 = vsel %vm298_vm2, %v343_v24, 0.0 }
 0x416   :  { %345 = vadd.xlane.f32.xlu0 %v344_v25 }
 0x432   :  { %v317_v26 = vpop.xlane.xlu1 %316 }
 0x433   :  { %v318_v30 = vsub.f32 0.0, %v317_v26 }
 0x436   :  { %v356_v31 = vpop.permute.xlu1 %355 }
 0x49f   :  { %v346_v29 = vpop.xlane.xlu0 %345 }
 0x4a0   :  { %v351_v0 = vsel %vm350_vm7, %v346_v29, %v349_v28 }
 0x4a1   :  { %v358_v32 = vsel %vm352_vm8, %v356_v31, %v351_v0 }
 0x4a2   :  { %v360_v33 = vsel %vm359_vm9, %v318_v30, %v358_v32 }
 0x4a3   :  { %361 = vst [vmem:[%s631_s3] sm:$0xff] %v360_v33 }
 0x4a4   :  { %366 = vsyncpa [#allocation3], 1 }

</bundles_post_ra>
